<compile_context>
chip_gen: v6e
topology: v6e:2x2x1
jax: 0.10.0
libtpu: 0.0.40
codegen_flags: <defaults>
</compile_context>

<pallas_src>
import math
from functools import partial

import jax
import jax.numpy as jnp
from jax.experimental import pallas as pl
from jax.experimental.pallas import tpu as pltpu


def _msa_kernel(x_ref, wqkv_ref, bqkv_ref, o_ref, *, n_heads, d_head, b_blk,
                seq_len):
    # x_ref    : (b_blk, S, hid_d) f32   — a block of full sequences
    # wqkv_ref : (hid_d, 3*hid_d) bf16   — block-diag [Wq*scale | Wk | Wv]
    # bqkv_ref : (1, 3*hid_d)     f32    — fused [bq*scale | bk | bv]
    # o_ref    : (b_blk, S, hid_d)       — lane-dense output slab
    hid_d = n_heads * d_head
    rows = b_blk * seq_len

    # Single fused QKV projection for ALL heads: M = b_blk*S, K = hid_d,
    # N = 3*hid_d. bf16 operands, f32 accumulation, f32 bias add.
    x = x_ref[...].reshape(rows, hid_d).astype(jnp.bfloat16)
    qkv = jnp.dot(x, wqkv_ref[...],
                  preferred_element_type=jnp.float32) + bqkv_ref[...]
    # qkv layout: [:, :hid_d] = Q (scale folded), [:, hid_d:2h] = K, rest = V;
    # within each group, head h owns columns h*d : (h+1)*d.

    for h in range(n_heads):  # n_heads is tiny; each iter stores immediately
        lo = h * d_head
        q = qkv[:, lo:lo + d_head]
        k = qkv[:, hid_d + lo:hid_d + lo + d_head]
        v = qkv[:, 2 * hid_d + lo:2 * hid_d + lo + d_head]

        # Split rows back into (batch-in-block, seq): major-dim reshape only.
        q = q.reshape(b_blk, seq_len, d_head).astype(jnp.bfloat16)
        k = k.reshape(b_blk, seq_len, d_head).astype(jnp.bfloat16)
        v = v.reshape(b_blk, seq_len, d_head).astype(jnp.bfloat16)

        # Batched q @ k^T over the batch block (scale already in q).
        s = jnp.einsum('bqd,bkd->bqk', q, k,
                       preferred_element_type=jnp.float32)

        # Numerically-stable softmax, fully in f32; exact divide for parity.
        m = jnp.max(s, axis=-1, keepdims=True)
        e = jnp.exp(s - m)
        attn = e / jnp.sum(e, axis=-1, keepdims=True)

        out_h = jnp.einsum('bqk,bkd->bqd', attn.astype(jnp.bfloat16), v,
                           preferred_element_type=jnp.float32)

        # Store this head directly at its static lane offset of the output
        # block (no concatenate); the pipeline writes the whole lane-dense
        # slab back to HBM once per grid step.
        o_ref[:, :, lo:lo + d_head] = out_h.astype(o_ref.dtype)


def _fuse_params(params, n_heads, d_head):
    """Fuse per-head q/k/v Linears into one block-diagonal (hid_d, 3*hid_d)
    weight (scale folded into the Q columns) and a (1, 3*hid_d) bias."""
    hid_d = n_heads * d_head
    scale = 1.0 / math.sqrt(d_head)

    def block_diag(w):  # (H, d, d) -> (hid_d, hid_d)
        out = jnp.zeros((hid_d, hid_d), w.dtype)
        for h in range(n_heads):
            out = out.at[h * d_head:(h + 1) * d_head,
                         h * d_head:(h + 1) * d_head].set(w[h])
        return out

    wq = block_diag(params["wq"]) * scale
    wk = block_diag(params["wk"])
    wv = block_diag(params["wv"])
    w_fused = jnp.concatenate([wq, wk, wv], axis=1)          # (hid_d, 3*hid_d)

    bq = params["bq"].reshape(1, hid_d) * scale
    bk = params["bk"].reshape(1, hid_d)
    bv = params["bv"].reshape(1, hid_d)
    b_fused = jnp.concatenate([bq, bk, bv], axis=1)          # (1, 3*hid_d)

    # Weights go to bf16 once outside the kernel (halves the weight DMA and
    # saves the in-kernel cast); bias stays f32 (added after f32 accumulate).
    return w_fused.astype(jnp.bfloat16), b_fused


def _pick_batch_block(batch, seq_len, target_rows=512):
    """Largest divisor of `batch` with b*seq_len <= target_rows (amortizes
    per-grid-step overhead and fills MXU rows)."""
    best = 1
    for cand in range(1, batch + 1):
        if batch % cand == 0 and cand * seq_len <= target_rows:
            best = cand
    return best


def msa_forward(x, params, n_heads):
    """x: (B, S, hid_d) float32.  params: dict of stacked per-head weights."""
    B, S, hid_d = x.shape
    d = hid_d // n_heads

    w_fused, b_fused = _fuse_params(params, n_heads, d)
    b_blk = _pick_batch_block(B, S)
    nb = B // b_blk

    kernel = partial(_msa_kernel, n_heads=n_heads, d_head=d, b_blk=b_blk,
                     seq_len=S)

    return pl.pallas_call(
        kernel,
        out_shape=jax.ShapeDtypeStruct((B, S, hid_d), x.dtype),
        grid_spec=pltpu.PrefetchScalarGridSpec(
            num_scalar_prefetch=0,
            grid=(nb,),
            in_specs=[
                # Activations: a block of b_blk full sequences, native layout.
                pl.BlockSpec((b_blk, S, hid_d), lambda i: (i, 0, 0)),
                # Fused weight / bias: constant block index -> DMAed once,
                # VMEM-resident for every grid step.
                pl.BlockSpec((hid_d, 3 * hid_d), lambda i: (0, 0)),
                pl.BlockSpec((1, 3 * hid_d), lambda i: (0, 0)),
            ],
            out_specs=pl.BlockSpec((b_blk, S, hid_d), lambda i: (i, 0, 0)),
        ),
        compiler_params=pltpu.CompilerParams(
            dimension_semantics=("parallel",),   # shard batch blocks over TCs
            vmem_limit_bytes=32 * 1024 * 1024,   # explicit, safe on v5e..v7x
        ),
    )(x, w_fused, b_fused)


def init_params(key, hid_d, n_heads):
    d = hid_d // n_heads
    keys = jax.random.split(key, 6)
    bound = 1.0 / math.sqrt(d)  # matches nn.Linear default init range

    def w(k):  # stored transposed: (H, in, out) so y = x @ W + b
        return jax.random.uniform(k, (n_heads, d, d), jnp.float32, -bound, bound)

    def b(k):
        return jax.random.uniform(k, (n_heads, 1, d), jnp.float32, -bound, bound)

    return {
        "wq": w(keys[0]), "bq": b(keys[1]),
        "wk": w(keys[2]), "bk": b(keys[3]),
        "wv": w(keys[4]), "bv": b(keys[5]),
    }


def msa_reference(x, params, n_heads):
    """Pure-JAX reference mirroring the PyTorch loop semantics (f32)."""
    B, S, hid_d = x.shape
    d = hid_d // n_heads
    outs = []
    for b in range(B):
        heads = []
        for h in range(n_heads):
            seq = x[b, :, h * d:(h + 1) * d]
            q = seq @ params["wq"][h] + params["bq"][h]
            k = seq @ params["wk"][h] + params["bk"][h]
            v = seq @ params["wv"][h] + params["bv"][h]
            attn = jax.nn.softmax(q @ k.T / math.sqrt(d), axis=-1)
            heads.append(attn @ v)
        outs.append(jnp.concatenate(heads, axis=-1)[None])
    return jnp.concatenate(outs, axis=0)


if __name__ == "__main__":
    B, S, hid_d, n_heads = 2, 8, 32, 2

    key = jax.random.PRNGKey(0)
    kx, kp = jax.random.split(key)
    x = jax.random.normal(kx, (B, S, hid_d), jnp.float32)
    params = init_params(kp, hid_d, n_heads)

    out = jax.block_until_ready(msa_forward(x, params, n_heads))
    ref = msa_reference(x, params, n_heads)

    assert out.shape == (B, S, hid_d)
    # Tolerance accounts for bf16 MXU operands (f32 accumulation, f32 softmax).
    assert jnp.allclose(out, ref, atol=1e-2, rtol=1e-2), float(
        jnp.max(jnp.abs(out - ref)))

    print("KERNEL_OK")
</pallas_src>

<mosaic_0001>
module attributes {stable_mosaic.version = 11 : i64} {
  func.func @_msa_kernel(%arg0: i32, %arg1: memref<2x8x32xf32, #tpu.memory_space<vmem>>, %arg2: memref<32x96xbf16, #tpu.memory_space<vmem>>, %arg3: memref<1x96xf32, #tpu.memory_space<vmem>>, %arg4: memref<2x8x32xf32, #tpu.memory_space<vmem>>) attributes {dimension_semantics = [#tpu.dimension_semantics<parallel>], iteration_bounds = array<i64: 1>, scalar_prefetch = 0 : i64, scratch_operands = 0 : i64, tpu.core_type = #tpu.core_type<tc>, window_params = [{transform_indices = @transform_0, window_bounds = array<i64: 2, 8, 32>}, {pipeline_mode = #tpu.pipeline_mode<synchronous>, transform_indices = @transform_1, window_bounds = array<i64: 32, 96>}, {pipeline_mode = #tpu.pipeline_mode<synchronous>, transform_indices = @transform_2, window_bounds = array<i64: 1, 96>}, {transform_indices = @transform_3, window_bounds = array<i64: 2, 8, 32>}]} {
    %c0 = arith.constant 0 : index
    %c0_0 = arith.constant 0 : index
    %c0_1 = arith.constant 0 : index
    %0 = vector.load %arg1[%c0, %c0_0, %c0_1] : memref<2x8x32xf32, #tpu.memory_space<vmem>>, vector<2x8x32xf32>
    %1 = vector.shape_cast %0 : vector<2x8x32xf32> to vector<16x32xf32>
    %2 = arith.truncf %1 : vector<16x32xf32> to vector<16x32xbf16>
    %c0_2 = arith.constant 0 : index
    %c0_3 = arith.constant 0 : index
    %3 = vector.load %arg2[%c0_2, %c0_3] : memref<32x96xbf16, #tpu.memory_space<vmem>>, vector<32x96xbf16>
    %cst = arith.constant dense<0.000000e+00> : vector<16x96xf32>
    %4 = tpu.matmul %2, %3, %cst {dimension_numbers = #tpu.dot_dimension_numbers<[1], [0], [0], [1], [0, 0, 1, 1], [], []>} : vector<16x32xbf16>, vector<32x96xbf16>, vector<16x96xf32> -> vector<16x96xf32>
    %c0_4 = arith.constant 0 : index
    %c0_5 = arith.constant 0 : index
    %5 = vector.load %arg3[%c0_4, %c0_5] : memref<1x96xf32, #tpu.memory_space<vmem>>, vector<1x96xf32>
    %6 = vector.broadcast %5 : vector<1x96xf32> to vector<16x96xf32>
    %7 = arith.addf %4, %6 : vector<16x96xf32>
    %8 = vector.extract_strided_slice %7 {offsets = [0, 0], sizes = [16, 16], strides = [1, 1]} : vector<16x96xf32> to vector<16x16xf32>
    %9 = vector.extract_strided_slice %7 {offsets = [0, 32], sizes = [16, 16], strides = [1, 1]} : vector<16x96xf32> to vector<16x16xf32>
    %10 = vector.extract_strided_slice %7 {offsets = [0, 64], sizes = [16, 16], strides = [1, 1]} : vector<16x96xf32> to vector<16x16xf32>
    %11 = vector.shape_cast %8 : vector<16x16xf32> to vector<2x8x16xf32>
    %12 = arith.truncf %11 : vector<2x8x16xf32> to vector<2x8x16xbf16>
    %13 = vector.shape_cast %9 : vector<16x16xf32> to vector<2x8x16xf32>
    %14 = arith.truncf %13 : vector<2x8x16xf32> to vector<2x8x16xbf16>
    %15 = vector.shape_cast %10 : vector<16x16xf32> to vector<2x8x16xf32>
    %16 = arith.truncf %15 : vector<2x8x16xf32> to vector<2x8x16xbf16>
    "tpu.trace_start"() <{level = 10 : i32, message = "bqd,bkd->bqk"}> : () -> ()
    %cst_6 = arith.constant dense<0.000000e+00> : vector<2x8x8xf32>
    %17 = tpu.matmul %12, %14, %cst_6 {dimension_numbers = #tpu.dot_dimension_numbers<[2], [2], [1], [1], [0, 0, 0, 1, 1, 1], [0], [0]>} : vector<2x8x16xbf16>, vector<2x8x16xbf16>, vector<2x8x8xf32> -> vector<2x8x8xf32>
    "tpu.trace_stop"() : () -> ()
    %cst_7 = arith.constant dense<0xFF800000> : vector<2x8xf32>
    %18 = vector.multi_reduction <maximumf>, %17, %cst_7 [2] : vector<2x8x8xf32> to vector<2x8xf32>
    %19 = vector.shape_cast %18 : vector<2x8xf32> to vector<2x8x1xf32>
    %20 = vector.broadcast %19 : vector<2x8x1xf32> to vector<2x8x8xf32>
    %21 = arith.subf %17, %20 : vector<2x8x8xf32>
    %22 = math.exp %21 : vector<2x8x8xf32>
    %cst_8 = arith.constant dense<0.000000e+00> : vector<2x8xf32>
    %23 = vector.multi_reduction <add>, %22, %cst_8 [2] : vector<2x8x8xf32> to vector<2x8xf32>
    %24 = vector.shape_cast %23 : vector<2x8xf32> to vector<2x8x1xf32>
    %25 = vector.broadcast %24 : vector<2x8x1xf32> to vector<2x8x8xf32>
    %26 = arith.divf %22, %25 : vector<2x8x8xf32>
    %27 = arith.truncf %26 : vector<2x8x8xf32> to vector<2x8x8xbf16>
    "tpu.trace_start"() <{level = 10 : i32, message = "bqk,bkd->bqd"}> : () -> ()
    %cst_9 = arith.constant dense<0.000000e+00> : vector<2x8x16xf32>
    %28 = tpu.matmul %27, %16, %cst_9 {dimension_numbers = #tpu.dot_dimension_numbers<[2], [1], [1], [2], [0, 0, 0, 1, 1, 2], [0], [0]>} : vector<2x8x8xbf16>, vector<2x8x16xbf16>, vector<2x8x16xf32> -> vector<2x8x16xf32>
    "tpu.trace_stop"() : () -> ()
    %c0_10 = arith.constant 0 : index
    %c0_11 = arith.constant 0 : index
    %c0_12 = arith.constant 0 : index
    %29 = vector.load %arg4[%c0_10, %c0_11, %c0_12] : memref<2x8x32xf32, #tpu.memory_space<vmem>>, vector<2x8x16xf32>
    tpu.vector_store %arg4[%c0_10, %c0_11, %c0_12], %28 {strides = array<i32>} : memref<2x8x32xf32, #tpu.memory_space<vmem>>, vector<2x8x16xf32>,
    %30 = vector.extract_strided_slice %7 {offsets = [0, 16], sizes = [16, 16], strides = [1, 1]} : vector<16x96xf32> to vector<16x16xf32>
    %31 = vector.extract_strided_slice %7 {offsets = [0, 48], sizes = [16, 16], strides = [1, 1]} : vector<16x96xf32> to vector<16x16xf32>
    %32 = vector.extract_strided_slice %7 {offsets = [0, 80], sizes = [16, 16], strides = [1, 1]} : vector<16x96xf32> to vector<16x16xf32>
    %33 = vector.shape_cast %30 : vector<16x16xf32> to vector<2x8x16xf32>
    %34 = arith.truncf %33 : vector<2x8x16xf32> to vector<2x8x16xbf16>
    %35 = vector.shape_cast %31 : vector<16x16xf32> to vector<2x8x16xf32>
    %36 = arith.truncf %35 : vector<2x8x16xf32> to vector<2x8x16xbf16>
    %37 = vector.shape_cast %32 : vector<16x16xf32> to vector<2x8x16xf32>
    %38 = arith.truncf %37 : vector<2x8x16xf32> to vector<2x8x16xbf16>
    "tpu.trace_start"() <{level = 10 : i32, message = "bqd,bkd->bqk"}> : () -> ()
    %cst_13 = arith.constant dense<0.000000e+00> : vector<2x8x8xf32>
    %39 = tpu.matmul %34, %36, %cst_13 {dimension_numbers = #tpu.dot_dimension_numbers<[2], [2], [1], [1], [0, 0, 0, 1, 1, 1], [0], [0]>} : vector<2x8x16xbf16>, vector<2x8x16xbf16>, vector<2x8x8xf32> -> vector<2x8x8xf32>
    "tpu.trace_stop"() : () -> ()
    %cst_14 = arith.constant dense<0xFF800000> : vector<2x8xf32>
    %40 = vector.multi_reduction <maximumf>, %39, %cst_14 [2] : vector<2x8x8xf32> to vector<2x8xf32>
    %41 = vector.shape_cast %40 : vector<2x8xf32> to vector<2x8x1xf32>
    %42 = vector.broadcast %41 : vector<2x8x1xf32> to vector<2x8x8xf32>
    %43 = arith.subf %39, %42 : vector<2x8x8xf32>
    %44 = math.exp %43 : vector<2x8x8xf32>
    %cst_15 = arith.constant dense<0.000000e+00> : vector<2x8xf32>
    %45 = vector.multi_reduction <add>, %44, %cst_15 [2] : vector<2x8x8xf32> to vector<2x8xf32>
    %46 = vector.shape_cast %45 : vector<2x8xf32> to vector<2x8x1xf32>
    %47 = vector.broadcast %46 : vector<2x8x1xf32> to vector<2x8x8xf32>
    %48 = arith.divf %44, %47 : vector<2x8x8xf32>
    %49 = arith.truncf %48 : vector<2x8x8xf32> to vector<2x8x8xbf16>
    "tpu.trace_start"() <{level = 10 : i32, message = "bqk,bkd->bqd"}> : () -> ()
    %cst_16 = arith.constant dense<0.000000e+00> : vector<2x8x16xf32>
    %50 = tpu.matmul %49, %38, %cst_16 {dimension_numbers = #tpu.dot_dimension_numbers<[2], [1], [1], [2], [0, 0, 0, 1, 1, 2], [0], [0]>} : vector<2x8x8xbf16>, vector<2x8x16xbf16>, vector<2x8x16xf32> -> vector<2x8x16xf32>
    "tpu.trace_stop"() : () -> ()
    %c0_17 = arith.constant 0 : index
    %c0_18 = arith.constant 0 : index
    %c16 = arith.constant 16 : index
    %51 = vector.load %arg4[%c0_17, %c0_18, %c16] : memref<2x8x32xf32, #tpu.memory_space<vmem>>, vector<2x8x16xf32>
    tpu.vector_store %arg4[%c0_17, %c0_18, %c16], %50 {strides = array<i32>} : memref<2x8x32xf32, #tpu.memory_space<vmem>>, vector<2x8x16xf32>,
    return
  }
  func.func @transform_0(%arg0: i32) -> (i32, i32, i32) {
    %c0_i32 = arith.constant 0 : i32
    %c0_i32_0 = arith.constant 0 : i32
    %c0_i32_1 = arith.constant 0 : i32
    return %arg0, %c0_i32, %c0_i32_0 : i32, i32, i32
  }
  func.func @transform_1(%arg0: i32) -> (i32, i32) {
    %c0_i32 = arith.constant 0 : i32
    %c0_i32_0 = arith.constant 0 : i32
    %c0_i32_1 = arith.constant 0 : i32
    return %c0_i32, %c0_i32_0 : i32, i32
  }
  func.func @transform_2(%arg0: i32) -> (i32, i32) {
    %c0_i32 = arith.constant 0 : i32
    %c0_i32_0 = arith.constant 0 : i32
    %c0_i32_1 = arith.constant 0 : i32
    return %c0_i32, %c0_i32_0 : i32, i32
  }
  func.func @transform_3(%arg0: i32) -> (i32, i32, i32) {
    %c0_i32 = arith.constant 0 : i32
    %c0_i32_0 = arith.constant 0 : i32
    %c0_i32_1 = arith.constant 0 : i32
    return %arg0, %c0_i32, %c0_i32_0 : i32, i32, i32
  }
}

</mosaic_0001>

<bundles_post_ra>
// kernel: tpu_custom_call.1
= control target key start
LH: loop header
LB: loop body
LE: loop exit
PB: predicated region body
PF: predicated region fallthrough
CT: control target
= control target key end

     0   :  { %8 = vsyncpa [#allocation3], 0  ;;  %s900_s0 = inlined_call_operand.hbm [shape: f32[2,8,32], index: 0, kind: input, shape index: {}]   ;;  %s901_s1 = inlined_call_operand.hbm [shape: bf16[32,96], index: 1, kind: input, shape index: {}]   ;;  %s902_s2 = inlined_call_operand.vmem [shape: f32[1,96], index: 2, kind: input, shape index: {}]   ;;  %s903_s3 = inlined_call_operand.hbm [shape: f32[2,8,32], index: 3, kind: output, shape index: {}]  }
   0x1   :  { %9 = vsyncpa [#allocation6], 0 }
   0x2   :  { %10 = vsyncpa [#allocation4], 0  ;;  %s774_s12 = smov [#allocation2]  }
   0x3   :  { %s16_s13 = sshll.u32 %s774_s12, 4  ;;  %s17_s13 = int_to_ptr.vmem [resolvable:$true] %s16_s13 }
   0x4   :  { %s716_s14 = scalar_lea.vmem %s17_s13, 256  ;;  %p721_p1 = scmp.lt.s32.totalorder %s17_s13, %s17_s13 }
   0x5   :  { %p717_p0 = scmp.ne.s32.totalorder %s17_s13, %s716_s14  ;;  %p722_p2 = scmp.lt.s32.totalorder %s716_s14, %s716_s14 }
   0x7   :  { %p723_p3 = por %p722_p2, %p721_p1 }
   0x9   :  { %p724_p4 = pnand %p723_p3, %p717_p0 }
   0xb   :  { %727 = shalt.err (!%p724_p4)
}
   0xc   :  { %s775_s15 = smov 128   ;;  %s776_s16 = smov 8  }
   0xd   :  { %22 = dma.hbm_to_vmem [thread:$0]  %s900_s0, 256, %s17_s13, [#allocation3], %s775_s15, %s775_s15, %s776_s16  }
   0xe   :  { %s777_s19 = smov [#allocation5]  }
   0xf   :  { %s28_s20 = sshll.u32 %s777_s19, 4  ;;  %s29_s20 = int_to_ptr.vmem [resolvable:$true] %s28_s20 }
  0x10   :  { %s736_s21 = scalar_lea.vmem %s29_s20, 256  ;;  %p741_p6 = scmp.lt.s32.totalorder %s29_s20, %s29_s20 }
  0x11   :  { %p737_p5 = scmp.ne.s32.totalorder %s29_s20, %s736_s21  ;;  %p742_p7 = scmp.lt.s32.totalorder %s736_s21, %s736_s21 }
  0x13   :  { %p743_p8 = por %p742_p7, %p741_p6 }
  0x15   :  { %p744_p9 = pnand %p743_p8, %p737_p5 }
  0x17   :  { %747 = shalt.err (!%p744_p9)
}
  0x18   :  { %s778_s22 = smov 64   ;;  %s779_s23 = smov 4  }
  0x19   :  { %34 = dma.hbm_to_vmem [thread:$0]  %s901_s1, 256, %s29_s20, [#allocation6], %s778_s22, %s778_s22, %s779_s23  }
  0x1a   :  { %768 = dma.done.wait [#allocation3], 256  }
  0x1b   :  { %769 = vsyncadd [#allocation3], 4294967040 }
  0x1c   :  { %770 = dma.done.wait [#allocation6], 256  }
  0x1d   :  { %771 = vsyncadd [#allocation6], 4294967040  ;;  %v780_v0 = vmov 0.0   ;;  %vm781_vm0 = vmmov 0   ;;  %v690_v1 = vld [vmem:[#allocation5 + $0x8] sm:$0xff]   ;;  %v691_v2 = vld [vmem:[#allocation5] sm:$0xff]  }
  0x1e   :  { %620 = vmatprep.subr.bf16.mxu0 %v780_v0  ;;  %624 = vmatprep.mubr.msk.bf16.mxu0 %vm781_vm0, %v780_v0  ;;  %v44_v3 = vld [vmem:[#allocation2] sm:$0xff]  ;;  %v45_v4 = vld [vmem:[#allocation2 + $0x8] sm:$0xff]  ;;  %vm70_vm1 = vcmask 261120   ;;  %s782_s26 = smov 96   ;;  %vm120_vm2 = vcmask 130048   ;;  %vm216_vm3 = vcmask 64512  }
  0x1f   :  { %628 = vmatprep.subr.bf16.mxu1 %v780_v0  ;;  %630 = vmatprep.mubr.msk.bf16.mxu1 %vm781_vm0, %v780_v0  ;;  %v46_v5 = vpack.c.bf16 %v45_v4, %v44_v3  ;;  %v589_v6 = vld [vmem:[%s902_s2] ss:$0 sm:$0xff]  ;;  %s783_s2 = smov 80   ;;  %vm246_vm4 = vcmask 1043456   ;;  %s784_s27 = smov 112   ;;  %vm568_vm5 = vcmask 261248  }
  0x20   :  { %621 = vmatpush3.bf16.msra.mxu0 %v690_v1  ;;  %s785_s28 = smov 48   ;;  %s786_s29 = smov 16  }
  0x21   :  { %622 = vmatprep.subr.bf16.mxu0 %v780_v0  ;;  %s787_s30 = smov [#allocation7]  }
  0x22   :  { %s576_s4 = sshll.u32 %s787_s30, 4  ;;  %s577_s4 = int_to_ptr.vmem [resolvable:$true] %s576_s4 }
  0x23   :  { %s748_s5 = scalar_lea.vmem %s577_s4, 256  ;;  %p753_p11 = scmp.lt.s32.totalorder %s577_s4, %s577_s4 }
  0x24   :  { %623 = vmatpush3.bf16.msra.mxu0 %v691_v2  ;;  %p749_p10 = scmp.ne.s32.totalorder %s577_s4, %s748_s5  ;;  %p754_p12 = scmp.lt.s32.totalorder %s748_s5, %s748_s5 }
  0x25   :  { %634 = vmatprep.subr.bf16.mxu0 %v780_v0 }
  0x26   :  { %p755_p13 = por %p754_p12, %p753_p11 }
  0x27   :  { %625 = vmatmul.mubr.msk.bf16.vlgmr.msra.gmra.mxu0 %vm70_vm1, %v46_v5 }
  0x28   :  { %636 = vmatprep.mubr.msk.bf16.mxu0 %vm781_vm0, %v780_v0  ;;  %p756_p0 = pnand %p755_p13, %p749_p10 }
  0xe7   :  { %v108_v7 = vpop.f32.mrf.mxu0 }
  0xe8   :  { %v109_v8 = vadd.f32 %v589_v6, %v108_v7 }
  0xe9   :  { %v626_v9 = vpop.f32.mrf.mxu0 }
  0xea   :  { %v832_v10 = vpack.c.bf16 %v109_v8, %v109_v8 }
  0xeb   :  { %v111_v11 = vpop.f32.mrf.mxu0 }
  0xec   :  { %v112_v12 = vadd.f32 %v589_v6, %v111_v11  ;;  %118 = vrot.lane.b32.xlu0 %v832_v10, %s782_s26 }
  0xed   :  { %v627_v13 = vpop.f32.mrf.mxu0 }
  0xee   :  { %v835_v14 = vpack.c.bf16 %v112_v12, %v112_v12 }
  0xf0   :  { %168 = vrot.lane.b32.xlu0 %v835_v14, %s782_s26 }
 0x15e   :  { %v119_v15 = vpop.permute.xlu0 %118 }
 0x15f   :  { %v125_v16 = vsel %vm120_vm2, %v119_v15, 0 }
 0x160   :  { %629 = vmatpush3.bf16.xpose.msra.mxu1 %v125_v16 }
 0x161   :  { %640 = vmatprep.subr.bf16.mxu1 %v780_v0 }
 0x162   :  { %v169_v17 = vpop.permute.xlu0 %168 }
 0x163   :  { %v174_v18 = vsel %vm120_vm2, %v169_v17, 0 }
 0x164   :  { %635 = vmatpush3.bf16.xpose.msra.mxu0 %v174_v18 }
 0x165   :  { %646 = vmatprep.subr.bf16.mxu0 %v780_v0 }
 0x167   :  { %631 = vmatmul.mubr.msk.bf16.vlgmr.msra.gmra.mxu1 %vm120_vm2, %v832_v10 }
 0x168   :  { %642 = vmatprep.mubr.msk.bf16.mxu1 %vm781_vm0, %v780_v0 }
 0x16b   :  { %637 = vmatmul.mubr.msk.bf16.vlgmr.msra.gmra.mxu0 %vm120_vm2, %v835_v14 }
 0x16c   :  { %648 = vmatprep.mubr.msk.bf16.mxu0 %vm781_vm0, %v780_v0 }
 0x227   :  { %v161_v19 = vpop.f32.mrf.mxu1 }
 0x228   :  { %v217_v20 = vsel %vm216_vm3, %v161_v19, -inf }
 0x229   :  { %218 = vmax.xlane.f32.xlu1 %v217_v20  ;;  %v632_v21 = vpop.f32.mrf.mxu1 }
 0x22b   :  { %v164_v22 = vpop.f32.mrf.mxu1  ;;  %v210_v23 = vpop.f32.mrf.mxu0 }
 0x22c   :  { %v220_v24 = vsel %vm216_vm3, %v210_v23, -inf }
 0x22d   :  { %v633_v25 = vpop.f32.mrf.mxu1  ;;  %221 = vmax.xlane.f32.xlu1 %v220_v24  ;;  %v638_v26 = vpop.f32.mrf.mxu0 }
 0x22f   :  { %v213_v27 = vpop.f32.mrf.mxu0 }
 0x231   :  { %v639_v28 = vpop.f32.mrf.mxu0 }
 0x23e   :  { %241 = vrot.lane.b32.xlu1 %v832_v10, %s778_s22 }
 0x242   :  { %290 = vrot.lane.b32.xlu1 %v835_v14, %s778_s22 }
 0x246   :  { %342 = vrot.lane.b32.xlu1 %v832_v10, %s783_s2 }
 0x2b2   :  { %v219_v29 = vpop.xlane.xlu1 %218 }
 0x2b3   :  { %v223_v30 = vsub.f32 %v161_v19, %v219_v29 }
 0x2b5   :  { %v225_v31 = vmul.f32 1.442695, %v223_v30 }
 0x2b6   :  { %v222_v32 = vpop.xlane.xlu1 %221 }
 0x2b7   :  { %692 = vpow2.f32 %v225_v31  ;;  %v224_v33 = vsub.f32 %v210_v23, %v222_v32 }
 0x2b9   :  { %v227_v34 = vmul.f32 1.442695, %v224_v33 }
 0x2ba   :  { %v242_v35 = vpop.permute.xlu1 %241 }
 0x2bb   :  { %694 = vpow2.f32 %v227_v34  ;;  %v248_v36 = vsel %vm246_vm4, %v242_v35, 0 }
 0x2bc   :  { %641 = vmatpush3.bf16.msra.mxu1 %v248_v36 }
 0x2bd   :  { %652 = vmatprep.subr.bf16.mxu1 %v780_v0 }
 0x2be   :  { %v291_v37 = vpop.permute.xlu1 %290 }
 0x2bf   :  { %v296_v38 = vsel %vm246_vm4, %v291_v37, 0 }
 0x2c0   :  { %647 = vmatpush3.bf16.msra.mxu0 %v296_v38 }
 0x2c1   :  { %658 = vmatprep.subr.bf16.mxu0 %v780_v0 }
 0x2c2   :  { %v343_v43 = vpop.permute.xlu1 %342 }
 0x2c3   :  { %v348_v50 = vsel %vm120_vm2, %v343_v43, 0 }
 0x2c4   :  { %v693_v39 = vpop.eup %692 }
 0x2c5   :  { %v229_v40 = vsel %vm216_vm3, %v693_v39, 0.0 }
 0x2c6   :  { %230 = vadd.xlane.f32.xlu0 %v229_v40 }
 0x2c8   :  { %v695_v41 = vpop.eup %694 }
 0x2c9   :  { %v232_v42 = vsel %vm216_vm3, %v695_v41, 0.0 }
 0x2ca   :  { %233 = vadd.xlane.f32.xlu1 %v232_v42 }
 0x2db   :  { %392 = vrot.lane.b32.xlu1 %v835_v14, %s783_s2 }
 0x2dc   :  { %340 = vrot.lane.b32.xlu0 %v832_v10, %s784_s27 }
 0x2df   :  { %390 = vrot.lane.b32.xlu1 %v835_v14, %s784_s27 }
 0x34f   :  { %v231_v44 = vpop.xlane.xlu0 %230 }
 0x350   :  { %696 = vrcp.f32 %v231_v44 }
 0x353   :  { %v234_v45 = vpop.xlane.xlu1 %233  ;;  %v341_v55 = vpop.permute.xlu0 %340 }
 0x354   :  { %698 = vrcp.f32 %v234_v45 }
 0x357   :  { %v393_v52 = vpop.permute.xlu1 %392 }
 0x358   :  { %v398_v54 = vsel %vm120_vm2, %v393_v52, 0 }
 0x35b   :  { %v391_v56 = vpop.permute.xlu1 %390 }
 0x35d   :  { %v697_v46 = vpop.eup %696 }
 0x35e   :  { %v236_v47 = vmul.f32 %v697_v46, %v693_v39 }
 0x360   :  { %v239_v48 = vpack.c.bf16 %v236_v47, %v236_v47 }
 0x361   :  { %v699_v49 = vpop.eup %698 }
 0x362   :  { %643 = vmatmul.mubr.msk.bf16.vlgmr.msra.gmra.mxu1 %vm216_vm3, %v239_v48  ;;  %v238_v51 = vmul.f32 %v699_v49, %v695_v41 }
 0x363   :  { %653 = vmatpush3.bf16.xpose.msra.mxu1 %v348_v50  ;;  %654 = vmatprep.mubr.msk.bf16.mxu1 %vm781_vm0, %v780_v0 }
 0x364   :  { %v240_v53 = vpack.c.bf16 %v238_v51, %v238_v51  ;;  %664 = vmatprep.subr.bf16.mxu1 %v780_v0 }
 0x366   :  { %649 = vmatmul.mubr.msk.bf16.vlgmr.msra.gmra.mxu0 %vm216_vm3, %v240_v53 }
 0x367   :  { %659 = vmatpush3.bf16.xpose.msra.mxu0 %v398_v54  ;;  %660 = vmatprep.mubr.msk.bf16.mxu0 %vm781_vm0, %v780_v0 }
 0x368   :  { %670 = vmatprep.subr.bf16.mxu0 %v780_v0 }
 0x36a   :  { %655 = vmatmul.mubr.msk.bf16.vlgmr.msra.gmra.mxu1 %vm120_vm2, %v341_v55 }
 0x36b   :  { %666 = vmatprep.mubr.msk.bf16.mxu1 %vm781_vm0, %v780_v0 }
 0x36e   :  { %661 = vmatmul.mubr.msk.bf16.vlgmr.msra.gmra.mxu0 %vm120_vm2, %v391_v56 }
 0x36f   :  { %672 = vmatprep.mubr.msk.bf16.mxu0 %vm781_vm0, %v780_v0 }
 0x422   :  { %v284_v57 = vpop.f32.mrf.mxu1 }
 0x423   :  { %338 = vst.msk [vmem:[#allocation7] sm:$0xff] %vm120_vm2, %v284_v57 }
 0x424   :  { %v644_v58 = vpop.f32.mrf.mxu1 }
 0x426   :  { %v287_v59 = vpop.f32.mrf.mxu1  ;;  %v332_v60 = vpop.f32.mrf.mxu0 }
 0x427   :  { %339 = vst.msk [vmem:[#allocation7 + $0x8] sm:$0xff] %vm120_vm2, %v332_v60 }
 0x428   :  { %v645_v61 = vpop.f32.mrf.mxu1  ;;  %v650_v62 = vpop.f32.mrf.mxu0 }
 0x42a   :  { %v335_v63 = vpop.f32.mrf.mxu0  ;;  %v384_v1 = vpop.f32.mrf.mxu1 }
 0x42b   :  { %v440_v2 = vsel %vm216_vm3, %v384_v1, -inf }
 0x42c   :  { %441 = vmax.xlane.f32.xlu1 %v440_v2  ;;  %v651_v3 = vpop.f32.mrf.mxu0  ;;  %v656_v4 = vpop.f32.mrf.mxu1 }
 0x42e   :  { %v387_v5 = vpop.f32.mrf.mxu1  ;;  %v434_v6 = vpop.f32.mrf.mxu0 }
 0x42f   :  { %v443_v0 = vsel %vm216_vm3, %v434_v6, -inf }
 0x430   :  { %v657_v7 = vpop.f32.mrf.mxu1  ;;  %444 = vmax.xlane.f32.xlu0 %v443_v0  ;;  %v662_v8 = vpop.f32.mrf.mxu0 }
 0x432   :  { %v437_v9 = vpop.f32.mrf.mxu0 }
 0x434   :  { %v663_v11 = vpop.f32.mrf.mxu0 }
 0x446   :  { %512 = vrot.lane.b32.xlu0 %v835_v14, %s785_s28 }
 0x4b5   :  { %v442_v12 = vpop.xlane.xlu1 %441 }
 0x4b6   :  { %v446_v13 = vsub.f32 %v384_v1, %v442_v12 }
 0x4b8   :  { %v448_v15 = vmul.f32 1.442695, %v446_v13 }
 0x4b9   :  { %v445_v16 = vpop.xlane.xlu0 %444 }
 0x4ba   :  { %700 = vpow2.f32 %v448_v15  ;;  %v447_v17 = vsub.f32 %v434_v6, %v445_v16 }
 0x4bc   :  { %v450_v18 = vmul.f32 1.442695, %v447_v17 }
 0x4bd   :  { %v513_v19 = vpop.permute.xlu0 %512 }
 0x4be   :  { %702 = vpow2.f32 %v450_v18  ;;  %v518_v20 = vsel %vm246_vm4, %v513_v19, 0 }
 0x4bf   :  { %671 = vmatpush3.bf16.msra.mxu0 %v518_v20 }
 0x4c7   :  { %v701_v21 = vpop.eup %700 }
 0x4c8   :  { %v452_v22 = vsel %vm216_vm3, %v701_v21, 0.0 }
 0x4c9   :  { %453 = vadd.xlane.f32.xlu1 %v452_v22 }
 0x4cb   :  { %v703_v23 = vpop.eup %702 }
 0x4cc   :  { %v455_v24 = vsel %vm216_vm3, %v703_v23, 0.0 }
 0x4cd   :  { %456 = vadd.xlane.f32.xlu1 %v455_v24 }
 0x4de   :  { %464 = vrot.lane.b32.xlu1 %v832_v10, %s785_s28 }
 0x552   :  { %v454_v14 = vpop.xlane.xlu1 %453 }
 0x553   :  { %704 = vrcp.f32 %v454_v14 }
 0x556   :  { %v457_v25 = vpop.xlane.xlu1 %456 }
 0x557   :  { %706 = vrcp.f32 %v457_v25 }
 0x55a   :  { %v465_v26 = vpop.permute.xlu1 %464 }
 0x55b   :  { %v470_v27 = vsel %vm246_vm4, %v465_v26, 0 }
 0x55c   :  { %665 = vmatpush3.bf16.msra.mxu1 %v470_v27 }
 0x560   :  { %v705_v28 = vpop.eup %704 }
 0x561   :  { %v459_v29 = vmul.f32 %v705_v28, %v701_v21 }
 0x563   :  { %v462_v30 = vpack.c.bf16 %v459_v29, %v459_v29 }
 0x564   :  { %v707_v31 = vpop.eup %706 }
 0x565   :  { %667 = vmatmul.mubr.msk.bf16.vlgmr.msra.gmra.mxu1 %vm216_vm3, %v462_v30  ;;  %v461_v32 = vmul.f32 %v707_v31, %v703_v23 }
 0x567   :  { %v463_v33 = vpack.c.bf16 %v461_v32, %v461_v32 }
 0x569   :  { %673 = vmatmul.mubr.msk.bf16.vlgmr.msra.gmra.mxu0 %vm216_vm3, %v463_v33 }
 0x625   :  { %v506_v34 = vpop.f32.mrf.mxu1 }
 0x626   :  { %562 = vrot.lane.b32.xlu1 %v506_v34, %s786_s29 }
 0x627   :  { %v668_v10 = vpop.f32.mrf.mxu1 }
 0x629   :  { %v509_v35 = vpop.f32.mrf.mxu1  ;;  %v554_v36 = vpop.f32.mrf.mxu0 }
 0x62a   :  { %564 = vrot.lane.b32.xlu1 %v554_v36, %s786_s29 }
 0x62b   :  { %v669_v37 = vpop.f32.mrf.mxu1  ;;  %v674_v38 = vpop.f32.mrf.mxu0 }
 0x62d   :  { %v557_v39 = vpop.f32.mrf.mxu0 }
 0x62f   :  { %v675_v40 = vpop.f32.mrf.mxu0 }
 0x698   :  { %v563_v41 = vpop.permute.xlu1 %562 }
 0x699   :  { %569 = vst.msk [vmem:[#allocation7] sm:$0xff] %vm568_vm5, %v563_v41 }
 0x69c   :  { %v565_v42 = vpop.permute.xlu1 %564 }
 0x69d   :  { %570 = vst.msk [vmem:[#allocation7 + $0x8] sm:$0xff] %vm568_vm5, %v565_v42 }
 0x69e   :  { %759 = shalt.err (!%p756_p0)
}
 0x69f   :  { %582 = dma.vmem_to_hbm [thread:$0]  %s577_s4, 256, %s903_s3, [#allocation4], %s775_s15, %s775_s15, %s776_s16  }
 0x6a0   :  { %772 = dma.done.wait [#allocation4], 256  }
 0x6a1   :  { %773 = vsyncadd [#allocation4], 4294967040 }
 0x6a2   :  { %586 = vsyncpa [#allocation3], 1 }
 0x6a3   :  { %587 = vsyncpa [#allocation6], 1 }
 0x6a4   :  { %588 = vsyncpa [#allocation4], 1 }

</bundles_post_ra>
